<compile_context>
chip_gen: v7x
topology: tpu7x:2x2x1
jax: 0.10.0
libtpu: 0.0.40
codegen_flags: <defaults>
</compile_context>

<pallas_src>
import jax
import jax.numpy as jnp
from jax.experimental import pallas as pl
from jax.experimental.pallas import tpu as pltpu


# ----------------------------------------------------------------------------
# Preferred (zero-copy) path: fuse the rearrange into the consumer kernel.
# ----------------------------------------------------------------------------
def head_split_in_spec(seq_tile: int, headdim: int) -> pl.BlockSpec:
    """BlockSpec a downstream kernel (grid axes (b, h, l)) can use to read head
    `h`'s (seq_tile, headdim) tile directly from the packed (B, L, H*P) array,
    making this materialized rearrange unnecessary."""
    return pl.BlockSpec((None, seq_tile, headdim), lambda b, h, l: (b, l, h))


# ----------------------------------------------------------------------------
# Materialized rearrange kernel.
# ----------------------------------------------------------------------------
def _make_head_split_kernel(num_heads: int, headdim: int):
    H, P = num_heads, headdim

    def kernel(x_ref, o_ref):
        # x_ref: (tl, H*P)   one sequence tile of the packed input (batch squeezed)
        # o_ref: (H, tl, P)  matching tile of the head-major output (batch squeezed)
        x = x_ref[...]
        for h in range(H):                        # static unroll; H is small
            # lane-boundary slice when P % 128 == 0 -> pure vreg selection
            o_ref[h] = x[:, h * P:(h + 1) * P]

    return kernel


def _pick_seq_tile(L: int, sublane: int, max_rows: int) -> int:
    """Largest multiple-of-`sublane` divisor of L that is <= max_rows.
    Falls back to the full extent L (always a legal block)."""
    best = None
    t = sublane
    limit = min(L, max_rows)
    while t <= limit:
        if L % t == 0:
            best = t
        t += sublane
    return best if best is not None else L


def rearrange_b_l_hp_to_b_h_l_p(x: jax.Array, num_heads: int) -> jax.Array:
    """einops.rearrange(x, 'b l (h p) -> b h l p', h=num_heads) as a Pallas kernel."""
    B, L, D = x.shape
    assert D % num_heads == 0, "packed channel dim must divide by num_heads"
    P = D // num_heads

    itemsize = jnp.dtype(x.dtype).itemsize
    # sublane packing: f32 -> 8, bf16 -> 16, int8/fp8 -> 32
    sublane = 8 * max(1, 4 // itemsize)

    # Size the sequence tile so one block is ~<= 2 MiB (double-buffered in+out
    # then stays well under every generation's scoped-VMEM limit), capped at
    # 1024 rows (diminishing pipeline returns beyond that).
    target_block_bytes = 2 * 1024 * 1024
    row_bytes = D * itemsize
    max_rows = max(sublane, (target_block_bytes // max(row_bytes, 1)) // sublane * sublane)
    max_rows = min(max_rows, 1024)
    tl = _pick_seq_tile(L, sublane, max_rows)

    grid = (B, L // tl)
    block_bytes = tl * D * itemsize  # input block == output block size
    vmem_limit = int(min(32 * 1024 * 1024, max(4 * 1024 * 1024, 8 * block_bytes)))

    kernel = _make_head_split_kernel(num_heads, P)

    return pl.pallas_call(
        kernel,
        out_shape=jax.ShapeDtypeStruct((B, num_heads, L, P), x.dtype),
        grid=grid,
        in_specs=[
            # Full packed width per step: wide contiguous HBM reads.
            pl.BlockSpec((None, tl, D), lambda b, l: (b, l, 0)),
        ],
        out_specs=pl.BlockSpec(
            (None, num_heads, tl, P), lambda b, l: (b, 0, l, 0)
        ),
        compiler_params=pltpu.CompilerParams(
            dimension_semantics=("parallel", "parallel"),
            vmem_limit_bytes=vmem_limit,
        ),
    )(x)


class Rearrange:
    """JAX/Pallas stand-in for the PyTorch Rearrange module (pattern fixed to
    the Mamba2 head-split pattern 'b l (h p) -> b h l p')."""

    def __init__(self, pattern: str, **kw):
        assert pattern == "b l (h p) -> b h l p", (
            "only the Mamba2 head-split pattern is implemented in-kernel"
        )
        # TODO(synk): general einops pattern parsing is glue, not kernel work.
        self.pattern = pattern
        self.kw = kw

    def __call__(self, x: jax.Array) -> jax.Array:
        D = x.shape[-1]
        if "h" in self.kw:
            num_heads = self.kw["h"]
        else:
            num_heads = D // self.kw["p"]
        return rearrange_b_l_hp_to_b_h_l_p(x, num_heads)


if __name__ == "__main__":
    # Small shapes consistent with the Mamba2 usage:
    #   batch B=2, seq L=16, heads H=4, headdim P=128  -> packed dim 512
    B, L, H, P = 2, 16, 4, 128
    key = jax.random.PRNGKey(0)
    x = jax.random.normal(key, (B, L, H * P), dtype=jnp.float32)

    mod = Rearrange("b l (h p) -> b h l p", h=H)
    y = mod(x)
    y = jax.block_until_ready(y)

    # Reference: plain JAX reshape + transpose (what einops.rearrange does).
    y_ref = x.reshape(B, L, H, P).transpose(0, 2, 1, 3)

    assert y.shape == (B, H, L, P), y.shape
    assert y.dtype == x.dtype
    assert jnp.array_equal(y, y_ref), "Pallas rearrange mismatch vs reference"

    print("KERNEL_OK")
</pallas_src>

<mosaic_0001>
module attributes {stable_mosaic.version = 11 : i64} {
  func.func @kernel(%arg0: i32, %arg1: i32, %arg2: memref<1x16x512xf32, #tpu.memory_space<vmem>>, %arg3: memref<1x4x16x128xf32, #tpu.memory_space<vmem>>) attributes {dimension_semantics = [#tpu.dimension_semantics<parallel>, #tpu.dimension_semantics<parallel>], iteration_bounds = array<i64: 2, 1>, scalar_prefetch = 0 : i64, scratch_operands = 0 : i64, tpu.core_type = #tpu.core_type<tc>, window_params = [{transform_indices = @transform_0, window_bounds = array<i64: 1, 16, 512>}, {transform_indices = @transform_1, window_bounds = array<i64: 1, 4, 16, 128>}]} {
    %c0 = arith.constant 0 : index
    %c0_0 = arith.constant 0 : index
    %c0_1 = arith.constant 0 : index
    %0 = vector.load %arg2[%c0, %c0_0, %c0_1] : memref<1x16x512xf32, #tpu.memory_space<vmem>>, vector<1x16x512xf32>
    %1 = vector.shape_cast %0 : vector<1x16x512xf32> to vector<16x512xf32>
    %2 = vector.extract_strided_slice %1 {offsets = [0, 0], sizes = [16, 128], strides = [1, 1]} : vector<16x512xf32> to vector<16x128xf32>
    %c0_2 = arith.constant 0 : index
    %c0_3 = arith.constant 0 : index
    %c0_4 = arith.constant 0 : index
    %c0_5 = arith.constant 0 : index
    %3 = vector.load %arg3[%c0_2, %c0_3, %c0_4, %c0_5] : memref<1x4x16x128xf32, #tpu.memory_space<vmem>>, vector<1x1x16x128xf32>
    %4 = vector.shape_cast %3 : vector<1x1x16x128xf32> to vector<16x128xf32>
    %5 = vector.shape_cast %2 : vector<16x128xf32> to vector<1x1x16x128xf32>
    tpu.vector_store %arg3[%c0_2, %c0_3, %c0_4, %c0_5], %5 {strides = array<i32>} : memref<1x4x16x128xf32, #tpu.memory_space<vmem>>, vector<1x1x16x128xf32>,
    %6 = vector.extract_strided_slice %1 {offsets = [0, 128], sizes = [16, 128], strides = [1, 1]} : vector<16x512xf32> to vector<16x128xf32>
    %c0_6 = arith.constant 0 : index
    %c1 = arith.constant 1 : index
    %c0_7 = arith.constant 0 : index
    %c0_8 = arith.constant 0 : index
    %7 = vector.load %arg3[%c0_6, %c1, %c0_7, %c0_8] : memref<1x4x16x128xf32, #tpu.memory_space<vmem>>, vector<1x1x16x128xf32>
    %8 = vector.shape_cast %7 : vector<1x1x16x128xf32> to vector<16x128xf32>
    %9 = vector.shape_cast %6 : vector<16x128xf32> to vector<1x1x16x128xf32>
    tpu.vector_store %arg3[%c0_6, %c1, %c0_7, %c0_8], %9 {strides = array<i32>} : memref<1x4x16x128xf32, #tpu.memory_space<vmem>>, vector<1x1x16x128xf32>,
    %10 = vector.extract_strided_slice %1 {offsets = [0, 256], sizes = [16, 128], strides = [1, 1]} : vector<16x512xf32> to vector<16x128xf32>
    %c0_9 = arith.constant 0 : index
    %c2 = arith.constant 2 : index
    %c0_10 = arith.constant 0 : index
    %c0_11 = arith.constant 0 : index
    %11 = vector.load %arg3[%c0_9, %c2, %c0_10, %c0_11] : memref<1x4x16x128xf32, #tpu.memory_space<vmem>>, vector<1x1x16x128xf32>
    %12 = vector.shape_cast %11 : vector<1x1x16x128xf32> to vector<16x128xf32>
    %13 = vector.shape_cast %10 : vector<16x128xf32> to vector<1x1x16x128xf32>
    tpu.vector_store %arg3[%c0_9, %c2, %c0_10, %c0_11], %13 {strides = array<i32>} : memref<1x4x16x128xf32, #tpu.memory_space<vmem>>, vector<1x1x16x128xf32>,
    %14 = vector.extract_strided_slice %1 {offsets = [0, 384], sizes = [16, 128], strides = [1, 1]} : vector<16x512xf32> to vector<16x128xf32>
    %c0_12 = arith.constant 0 : index
    %c3 = arith.constant 3 : index
    %c0_13 = arith.constant 0 : index
    %c0_14 = arith.constant 0 : index
    %15 = vector.load %arg3[%c0_12, %c3, %c0_13, %c0_14] : memref<1x4x16x128xf32, #tpu.memory_space<vmem>>, vector<1x1x16x128xf32>
    %16 = vector.shape_cast %15 : vector<1x1x16x128xf32> to vector<16x128xf32>
    %17 = vector.shape_cast %14 : vector<16x128xf32> to vector<1x1x16x128xf32>
    tpu.vector_store %arg3[%c0_12, %c3, %c0_13, %c0_14], %17 {strides = array<i32>} : memref<1x4x16x128xf32, #tpu.memory_space<vmem>>, vector<1x1x16x128xf32>,
    return
  }
  func.func @transform_0(%arg0: i32, %arg1: i32) -> (i32, i32, i32) {
    %c0_i32 = arith.constant 0 : i32
    %c0_i32_0 = arith.constant 0 : i32
    return %arg0, %arg1, %c0_i32 : i32, i32, i32
  }
  func.func @transform_1(%arg0: i32, %arg1: i32) -> (i32, i32, i32, i32) {
    %c0_i32 = arith.constant 0 : i32
    %c0_i32_0 = arith.constant 0 : i32
    %c0_i32_1 = arith.constant 0 : i32
    return %arg0, %c0_i32, %arg1, %c0_i32_0 : i32, i32, i32, i32
  }
}

</mosaic_0001>

<bundles_post_ra>
// kernel: tpu_custom_call.1
= control target key start
LH: loop header
LB: loop body
LE: loop exit
PB: predicated region body
PF: predicated region fallthrough
CT: control target
= control target key end

     0   :  { %6 = vsyncpa [#allocation3], 0  ;;  %s672_s0 = inlined_call_operand.hbm [shape: f32[2,16,512], index: 0, kind: input, shape index: {}]   ;;  %s673_s1 = inlined_call_operand.hbm [shape: f32[2,4,16,128], index: 1, kind: output, shape index: {}]  }
   0x1   :  { %8 = vsyncpa [#allocation3 + $0x1], 0 }
   0x2   :  { %9 = vsyncpa [#allocation4], 0 }
   0x3   :  { %11 = vsyncpa [#allocation4 + $0x1], 0  ;;  %s497_s6 = smov 0   ;;  %s499_s7 = smov 0  }
   0x4   :  { %s501_s8 = smov 0   ;;  %s503_s9 = smov 0  }
   0x5   :  { %s505_s10 = smov 0   ;;  %s507_s11 = smov 0  }
   0x6 LB: > { %s278_s12 = sadd.s32 4294967295, %s479_s11   ;;  %s279_s13 = sadd.s32 4294967294, %s479_s11   ;;  %s479_s11 = sphi %s507_s11, %s17_s11   ;;  %s475_s10 = sphi %s505_s10, %s688_s10   ;;  %s471_s9 = sphi %s503_s9, %s687_s9   ;;  %s467_s8 = sphi %s501_s8, %s686_s8   ;;  %s463_s7 = sphi %s499_s7, %s685_s7   ;;  %s459_s6 = sphi %s497_s6, %s684_s6  }
   0x7   : > { %s29_s14 = sadd.s32 1, %s475_s10  ;;  %s38_s15 = sadd.s32 1, %s467_s8 }
   0x8   : > { %p31_p0 = scmp.ge.s32.totalorder %s29_s14, 2  ;;  %p45_p1 = scmp.ne.s32.totalorder %s467_s8, %s463_s7 }
   0x9   : > { %p46_p2 = scmp.eq.s32.totalorder %s479_s11, 0  ;;  %p51_p3 = scmp.ne.s32.totalorder %s463_s7, %s459_s6 }
   0xa   : > { %s690_s14 = smov (%p31_p0, %s29_s14), 0  ;;  %p52_p5 = scmp.eq.s32.totalorder %s278_s12, 0 }
   0xb   : > { %p538_p4 = por %p46_p2, %p45_p1  ;;  %s33_s17 = ssub.s32 %s475_s10, %s690_s14 }
   0xc   : > { %p77_p6 = scmp.eq.s32.totalorder %s278_s12, 1  ;;  %p36_p7 = scmp.eq.s32.totalorder %s33_s17, 0 }
   0xd   : > { %p544_p8 = por %p52_p5, %p51_p3  ;;  %p83_p10 = scmp.eq.s32.totalorder %s279_s13, 1 }
   0xe   : > { %p548_p9 = por %p77_p6, %p45_p1  ;;  %p313_p13 = scmp.lt.s32.totalorder %s479_s11, 2 }
   0xf   : > { %s553_s20 = scalar_select %p36_p7, %s467_s8, %s38_s15  }
  0x10   : > { %s677_s19 = scalar_select %p548_p9, 1, 0 }
  0x11   : > { %p555_p11 = por %p83_p10, %p51_p3  ;;  %s103_s22 = sand.u32 1, %s467_s8  }
  0x12   : > { %s282_s23 = sshll.u32 %s103_s22, 6  ;;  %s299_s24 = sshll.u32 %s475_s10, 10 }
  0x13   : > { %s678_s21 = scalar_select %p555_p11, 1, 0 }
  0x14   : > { %s566_s27 = scalar_lea.hbm %s672_s0, %s299_s24  ;;  %s107_s28 = scalar_lea.vmem [#allocation2], %s282_s23 }
  0x15   : > { %s117_s29 = sshll.u32 %s107_s28, 4  ;;  %p572_p0 = pnand %p313_p13, %p538_p4  ;;  %s568_s29 = int_to_ptr.vmem [resolvable:$true] %s117_s29 }
  0x16   : > { %s577_s2 = scalar_lea.sflag [#allocation3], %s103_s22  ;;  %s367_s3 = scalar_lea.hbm %s566_s27, 1024 }
  0x17   : > { %p368_p2 = scmp.ne.s32.totalorder %s566_s27, %s367_s3  ;;  %p369_p3 = pneg %p572_p0 }
  0x18   : > { %s372_s12 = scalar_lea.hbm %s672_s0, 2048  ;;  %p373_p4 = scmp.lt.u32.totalorder %s566_s27, %s672_s0 }
  0x19   : > { %p370_p5 = pnand %p369_p3, %p368_p2  ;;  %p374_p7 = scmp.lt.u32.totalorder %s372_s12, %s367_s3 }
  0x1a   : > { %p376_p13 = scmp.lt.u32.totalorder %s367_s3, %s566_s27 }
  0x1b   : > { %p371_p6 = pneg %p370_p5  ;;  %p375_p10 = por %p374_p7, %p373_p4 }
  0x1d   : > { %p377_p12 = por %p376_p13, %p375_p10 }
  0x1f   : > { %p378_p1 = pnand %p377_p12, %p371_p6 }
  0x21   : > { %381 = shalt.err (!%p378_p1)
}
  0x22   : > { %s382_s16 = scalar_lea.vmem %s568_s29, 1024  ;;  %s481_s17 = smov [#allocation2]  }
  0x23   : > { %p383_p2 = scmp.ne.s32.totalorder %s568_s29, %s382_s16  ;;  %s387_s22 = sshll.u32 %s481_s17, 4  ;;  %s388_s22 = int_to_ptr.vmem [resolvable:$false] %s387_s22 }
  0x24   : > { %s389_s23 = scalar_lea.vmem %s388_s22, 2048  ;;  %p390_p9 = scmp.lt.s32.totalorder %s568_s29, %s388_s22 }
  0x25   : > { %p385_p5 = pnand %p383_p2, %p369_p3  ;;  %p391_p4 = scmp.lt.s32.totalorder %s389_s23, %s382_s16 }
  0x27   : > { %p386_p11 = pneg %p385_p5  ;;  %p392_p7 = por %p391_p4, %p390_p9 }
  0x29   : > { %p393_p10 = pnand %p392_p7, %p386_p11 }
  0x2b   : > { %396 = shalt.err (!%p393_p10)
}
  0x2c   : > { %s482_s24 = smov 512   ;;  %s483_s25 = smov 32  }
  0x2d   : > { %308 = dma.hbm_to_vmem [thread:$0]  (!%p572_p0), %s566_s27, 1024, %s568_s29, %s577_s2, %s482_s24, %s482_s24, %s483_s25  }
  0x2e   : > { %p125_p12 = scmp.lt.s32.totalorder %s479_s11, 3  ;;  %p680_p1 = scmp.ge.s32.totalorder %s479_s11, 1 }
  0x30   : > { %p126_p3 = pnand %p680_p1, %p125_p12 }
  0x31   : > { %s609_s26 = sand.u32 (!%p126_p3), 1, %s463_s7  }
  0x32   : > { %129 = sbr.rel (%p126_p3) target bundleno = 85 (0x55), region = 24  ;;  %s286_s28 = sshll.u32 (!%p126_p3), %s609_s26, 6 }
  0x33   : > { %s132_s3 = scalar_lea.sflag (!%p126_p3), [#allocation3], %s609_s26  ;;  %s135_s4 = scalar_lea.vmem (!%p126_p3), [#allocation2], %s286_s28 }
  0x39   : > { %450 = dma.done.wait (%p544_p8), %s132_s3, 1024  }
  0x3a   : > { %452 = vsyncadd (%p544_p8), %s132_s3, 4294966272  ;;  %s153_s27 = scalar_lea.vmem [#allocation5], %s286_s28  ;;  %s300_s30 = sshll.u32 %s471_s9, 10  ;;  %v156_v0 = vld [vmem:[%s135_s4] sm:$0xff]  ;;  %v157_v2 = vld [vmem:[%s135_s4 + $0x8] sm:$0xff] }
  0x3b   : > { %s191_s29 = sshll.u32 %s153_s27, 4  ;;  %v160_v1 = vld [vmem:[%s135_s4 + $0x20] sm:$0xff]  ;;  %s623_s12 = scalar_lea.hbm %s673_s1, %s300_s30  ;;  %164 = vst [vmem:[%s153_s27] sm:$0xff] %v156_v0  ;;  %288 = vst [vmem:[%s153_s27 + $0x10] sm:$0xff] %v157_v2  ;;  %v161_v3 = vld [vmem:[%s135_s4 + $0x28] sm:$0xff]  ;;  %s618_s29 = int_to_ptr.vmem [resolvable:$true] %s191_s29 }
  0x3c   : > { %165 = vst [vmem:[%s153_s27 + $0x8] sm:$0xff] %v160_v1  ;;  %v158_v4 = vld [vmem:[%s135_s4 + $0x10] sm:$0xff]  ;;  %289 = vst [vmem:[%s153_s27 + $0x18] sm:$0xff] %v161_v3  ;;  %v159_v6 = vld [vmem:[%s135_s4 + $0x18] sm:$0xff]  ;;  %s176_s9 = scalar_lea.sflag [#allocation4], %s609_s26  ;;  %s397_s18 = scalar_lea.vmem %s618_s29, 1024 }
  0x3d   : > { %v162_v5 = vld [vmem:[%s135_s4 + $0x30] sm:$0xff]  ;;  %290 = vst [vmem:[%s153_s27 + $0x20] sm:$0xff] %v158_v4  ;;  %v163_v7 = vld [vmem:[%s135_s4 + $0x38] sm:$0xff]  ;;  %292 = vst [vmem:[%s153_s27 + $0x30] sm:$0xff] %v159_v6  ;;  %p398_p8 = scmp.ne.s32.totalorder %s618_s29, %s397_s18  ;;  %p681_p9 = scmp.ne.s32.totalorder %s677_s19, 0 }
  0x3e   : > { %291 = vst [vmem:[%s153_s27 + $0x28] sm:$0xff] %v162_v5  ;;  %293 = vst [vmem:[%s153_s27 + $0x38] sm:$0xff] %v163_v7  ;;  %s484_s13 = smov [#allocation5]  }
  0x3f   : > { %p399_p11 = pnand %p398_p8, %p681_p9  ;;  %s401_s15 = sshll.u32 %s484_s13, 4  ;;  %s402_s15 = int_to_ptr.vmem [resolvable:$false] %s401_s15 }
  0x40   : > { %s403_s16 = scalar_lea.vmem %s402_s15, 2048  ;;  %p404_p6 = scmp.lt.s32.totalorder %s618_s29, %s402_s15 }
  0x41   : > { %p400_p0 = pneg %p399_p11  ;;  %p405_p13 = scmp.lt.s32.totalorder %s403_s16, %s397_s18 }
  0x43   : > { %p406_p2 = por %p405_p13, %p404_p6 }
  0x45   : > { %p407_p5 = pnand %p406_p2, %p400_p0 }
  0x47   : > { %410 = shalt.err (!%p407_p5)
}
  0x48   : > { %s411_s17 = scalar_lea.hbm %s623_s12, 1024  ;;  %s415_s24 = scalar_lea.hbm %s673_s1, 2048 }
  0x49   : > { %p412_p4 = scmp.ne.s32.totalorder %s623_s12, %s411_s17  ;;  %p416_p12 = scmp.lt.u32.totalorder %s623_s12, %s673_s1 }
  0x4a   : > { %p417_p1 = scmp.lt.u32.totalorder %s415_s24, %s411_s17  ;;  %p419_p8 = scmp.lt.u32.totalorder %s411_s17, %s623_s12 }
  0x4b   : > { %p413_p7 = pnand %p412_p4, %p681_p9 }
  0x4c   : > { %p418_p3 = por %p417_p1, %p416_p12 }
  0x4d   : > { %p414_p10 = pneg %p413_p7 }
  0x4e   : > { %p420_p11 = por %p419_p8, %p418_p3 }
  0x50   : > { %p421_p0 = pnand %p420_p11, %p414_p10 }
  0x52   : > { %424 = shalt.err (!%p421_p0)
}
  0x53   : > { %s485_s3 = smov 128   ;;  %s486_s4 = smov 8  }
  0x54   : > { %303 = dma.vmem_to_hbm [thread:$0]  (%p681_p9), %s618_s29, 1024, %s623_s12, %s176_s9, %s485_s3, %s485_s3, %s486_s4  }
  0x55 PF: > { %s206_s27 = sand.u32 1, %s459_s6   ;;  %p682_p6 = scmp.ne.s32.totalorder %s678_s21, 0 }
  0x56   : > { %p683_p13 = scmp.ge.s32.totalorder %s479_s11, 2  ;;  %s207_s30 = scalar_lea.sflag [#allocation4], %s206_s27 }
  0x58   : > { %p310_p2 = pnand %p683_p13, %p682_p6 }
  0x5a   : > { %454 = dma.done.wait (!%p310_p2), %s207_s30, 1024  }
  0x5b   : > { %456 = vsyncadd (!%p310_p2), %s207_s30, 4294966272  ;;  %s17_s11 = sadd.s32 1, %s479_s11   ;;  %s684_s6 = smov %s463_s7 }
  0x5c   : > { %p14_p5 = scmp.ge.s32.totalorder %s17_s11, 4   ;;  %s685_s7 = smov %s467_s8 }
  0x5d   : > { %s686_s8 = smov %s553_s20  ;;  %s687_s9 = smov %s475_s10 }
  0x5e   : > { %s688_s10 = smov %s690_s14  ;;  %16 = sbr.rel (!%p14_p5) target bundleno = 6 (0x6), region = 72 }
  0x65   :  { %212 = vsyncpa [#allocation3], 1 }
  0x66   :  { %214 = vsyncpa [#allocation3 + $0x1], 1 }
  0x67   :  { %215 = vsyncpa [#allocation4], 1 }
  0x68   :  { %217 = vsyncpa [#allocation4 + $0x1], 1 }

</bundles_post_ra>
